<compile_context>
chip_gen: v7x
topology: tpu7x:2x2x1
jax: 0.10.0
libtpu: 0.0.40
codegen_flags: <defaults>
</compile_context>

<pallas_src>
import functools

import jax
import jax.numpy as jnp
from jax.experimental import pallas as pl
from jax.experimental.pallas import tpu as pltpu

# ---- module hyper-parameters (globals in the original script) ---------------
INPUT_SIZE = 32
HIDDEN_SIZE = INPUT_SIZE + 10          # 42
OUTPUT_SIZE = 8
NUM_HIDDEN_LAYERS = 3
BATCH = 2
PAD = 128                              # lane-dense feature padding
MAX_BATCH_TILE = 512                   # batch-grid tile for large B


# ----------------------------- Pallas kernel --------------------------------
def _mlp_kernel(x_ref, w0_ref, w_ref, b_ref, o_ref, *, n_rest):
    """Fused forward pass over pre-packed, pre-transposed bf16 weight stacks.

    x_ref  : (TB, INPUT_SIZE) f32    -- raw input tile (no wrapper padding)
    w0_ref : (INPUT_SIZE, PAD) bf16  -- fc1 weight, (in, out) oriented
    w_ref  : (n_rest, PAD, PAD) bf16 -- hidden + last weights, (in, out)
    b_ref  : (n_rest+1, 1, PAD) f32  -- all biases, zero beyond true width
    o_ref  : (TB, PAD) f32           -- lane-dense padded output slab
    """
    # Layer 0 contracts over the real 32 input features; the zero-padded
    # weight columns / zero bias padding guarantee lanes >= HIDDEN_SIZE of h
    # stay exactly zero through the rest of the chain.
    h = jnp.dot(x_ref[...].astype(jnp.bfloat16), w0_ref[...],
                preferred_element_type=jnp.float32) + b_ref[0]
    for i in range(n_rest):            # small static trip count -> unrolled
        h = jnp.dot(h.astype(jnp.bfloat16), w_ref[i],
                    preferred_element_type=jnp.float32) + b_ref[i + 1]
    o_ref[...] = h.astype(o_ref.dtype)


def mlp_forward(x, w_first, w_rest, b_stack):
    """x: (B, INPUT_SIZE) -> lane-dense (B, PAD) slab.

    Only the first OUTPUT_SIZE lanes are meaningful; the remaining lanes are
    exactly zero.  Slice in the consumer (keeps this call free of extra
    wrapper-side XLA pad/slice launches).
    """
    B, in_f = x.shape
    n_rest, pad = w_rest.shape[0], w_rest.shape[2]
    n_layers = n_rest + 1

    # Batch tile: full-array block for small B (legal for any B), otherwise a
    # multiple-of-8 tile so the grid / BlockSpec tiling constraints hold.
    tb = B if B <= MAX_BATCH_TILE else MAX_BATCH_TILE
    grid = (pl.cdiv(B, tb),)

    cost = pl.CostEstimate(
        flops=2 * B * (in_f * pad + n_rest * pad * pad),
        transcendentals=0,
        bytes_accessed=(x.size * x.dtype.itemsize
                        + w_first.size * w_first.dtype.itemsize
                        + w_rest.size * w_rest.dtype.itemsize
                        + b_stack.size * b_stack.dtype.itemsize
                        + B * pad * 4),
    )

    kernel = functools.partial(_mlp_kernel, n_rest=n_rest)
    out_pad = pl.pallas_call(
        kernel,
        out_shape=jax.ShapeDtypeStruct((B, pad), jnp.float32),
        grid=grid,
        in_specs=[
            pl.BlockSpec((tb, in_f), lambda i: (i, 0)),            # x tile
            pl.BlockSpec((in_f, pad), lambda i: (0, 0)),           # fc1 W
            pl.BlockSpec((n_rest, pad, pad), lambda i: (0, 0, 0)),  # W stack
            pl.BlockSpec((n_layers, 1, pad), lambda i: (0, 0, 0)),  # biases
        ],
        out_specs=pl.BlockSpec((tb, pad), lambda i: (i, 0)),
        compiler_params=pltpu.CompilerParams(
            dimension_semantics=("parallel",)),
        cost_estimate=cost,
    )(x, w_first, w_rest, b_stack)
    return out_pad


# ------------------------- parameter init / packing --------------------------
def xavier_uniform(key, out_f, in_f, dtype=jnp.float32):
    limit = (6.0 / (in_f + out_f)) ** 0.5
    return jax.random.uniform(key, (out_f, in_f), dtype, -limit, limit)


def linear_bias(key, in_f, out_f, dtype=jnp.float32):
    # PyTorch default nn.Linear bias init: U(-1/sqrt(fan_in), 1/sqrt(fan_in))
    bound = 1.0 / (in_f ** 0.5)
    return jax.random.uniform(key, (out_f,), dtype, -bound, bound)


def init_params(key):
    """Raw PyTorch-style parameters (weights stored [out, in], f32)."""
    keys = jax.random.split(key, 4 + 2 * NUM_HIDDEN_LAYERS)
    w1 = xavier_uniform(keys[0], HIDDEN_SIZE, INPUT_SIZE)
    b1 = linear_bias(keys[1], INPUT_SIZE, HIDDEN_SIZE)
    wh_list, bh_list = [], []
    for i in range(NUM_HIDDEN_LAYERS):
        wh_list.append(xavier_uniform(keys[2 + 2 * i], HIDDEN_SIZE, HIDDEN_SIZE))
        bh_list.append(linear_bias(keys[3 + 2 * i], HIDDEN_SIZE, HIDDEN_SIZE))
    wh = (jnp.stack(wh_list) if NUM_HIDDEN_LAYERS > 0
          else jnp.zeros((0, HIDDEN_SIZE, HIDDEN_SIZE), jnp.float32))
    bh = (jnp.stack(bh_list) if NUM_HIDDEN_LAYERS > 0
          else jnp.zeros((0, HIDDEN_SIZE), jnp.float32))
    wl = xavier_uniform(keys[-2], OUTPUT_SIZE, HIDDEN_SIZE)
    bl = linear_bias(keys[-1], HIDDEN_SIZE, OUTPUT_SIZE)
    return w1, b1, wh, bh, wl, bl


def pack_params(w1, b1, wh, bh, wl, bl, pad=PAD,
                w_dtype=jnp.bfloat16, b_dtype=jnp.float32):
    """One-time packing: pre-transpose + lane-pad + bf16-cast all weights.

    Padding rows/cols are built from zeros and never overwritten, so the
    padded lanes of the activation slab stay exactly zero through the chain.
    """
    L = wh.shape[0]
    n_rest = L + 1                     # hidden layers + fc_last
    hid, in_f = w1.shape
    out_f = wl.shape[0]

    # fc1: (in_f -> hid), stored at its real input width (no zero DMA rows).
    w_first = jnp.zeros((in_f, pad), w_dtype).at[:, :hid].set(
        w1.T.astype(w_dtype))

    w_rest = jnp.zeros((n_rest, pad, pad), w_dtype)
    for i in range(L):                 # hidden layers: (hid -> hid)
        w_rest = w_rest.at[i, :hid, :hid].set(wh[i].T.astype(w_dtype))
    w_rest = w_rest.at[n_rest - 1, :hid, :out_f].set(
        wl.T.astype(w_dtype))         # fc_last: (hid -> out_f)

    b_stack = jnp.zeros((L + 2, 1, pad), b_dtype)
    b_stack = b_stack.at[0, 0, :hid].set(b1.astype(b_dtype))
    for i in range(L):
        b_stack = b_stack.at[1 + i, 0, :hid].set(bh[i].astype(b_dtype))
    b_stack = b_stack.at[L + 1, 0, :out_f].set(bl.astype(b_dtype))
    return w_first, w_rest, b_stack


# ------------------------------ reference ------------------------------------
def mlp_reference(x, w1, b1, wh, bh, wl, bl):
    h = x @ w1.T + b1
    for i in range(wh.shape[0]):
        h = h @ wh[i].T + bh[i]
    return h @ wl.T + bl


if __name__ == "__main__":
    key = jax.random.PRNGKey(0)
    k_x, k_p = jax.random.split(key)
    x = jax.random.normal(k_x, (BATCH, INPUT_SIZE), jnp.float32)
    raw_params = init_params(k_p)

    # One-time layout plumbing (pre-transpose + pad + bf16 cast).
    w_first, w_rest, b_stack = pack_params(*raw_params)

    out_pad = mlp_forward(x, w_first, w_rest, b_stack)
    out_pad = jax.block_until_ready(out_pad)

    # Consumer-side slice of the live output lanes.
    out = out_pad[:, :OUTPUT_SIZE]

    ref = mlp_reference(x, *raw_params)
    assert out.shape == (BATCH, OUTPUT_SIZE), out.shape
    # Padded lanes must be exactly zero by construction.
    assert jnp.all(out_pad[:, OUTPUT_SIZE:] == 0.0), "padding lanes not zero"
    # bf16 weights/activations on a 5-layer chain -> loosened tolerance.
    assert jnp.allclose(out, ref, atol=5e-2, rtol=5e-2), (
        "mismatch vs. pure-JAX f32 reference")

    print("KERNEL_OK")
</pallas_src>

<mosaic_0001>
module attributes {stable_mosaic.version = 11 : i64} {
  func.func @_mlp_kernel(%arg0: i32, %arg1: memref<2x32xf32, #tpu.memory_space<vmem>>, %arg2: memref<32x128xbf16, #tpu.memory_space<vmem>>, %arg3: memref<4x128x128xbf16, #tpu.memory_space<vmem>>, %arg4: memref<5x1x128xf32, #tpu.memory_space<vmem>>, %arg5: memref<2x128xf32, #tpu.memory_space<vmem>>) attributes {dimension_semantics = [#tpu.dimension_semantics<parallel>], iteration_bounds = array<i64: 1>, scalar_prefetch = 0 : i64, scratch_operands = 0 : i64, tpu.core_type = #tpu.core_type<tc>, window_params = [{transform_indices = @transform_0, window_bounds = array<i64: 2, 32>}, {pipeline_mode = #tpu.pipeline_mode<synchronous>, transform_indices = @transform_1, window_bounds = array<i64: 32, 128>}, {pipeline_mode = #tpu.pipeline_mode<synchronous>, transform_indices = @transform_2, window_bounds = array<i64: 4, 128, 128>}, {pipeline_mode = #tpu.pipeline_mode<synchronous>, transform_indices = @transform_3, window_bounds = array<i64: 5, 1, 128>}, {transform_indices = @transform_4, window_bounds = array<i64: 2, 128>}]} {
    %c0 = arith.constant 0 : index
    %c0_0 = arith.constant 0 : index
    %0 = vector.load %arg1[%c0, %c0_0] : memref<2x32xf32, #tpu.memory_space<vmem>>, vector<2x32xf32>
    %1 = arith.truncf %0 : vector<2x32xf32> to vector<2x32xbf16>
    %c0_1 = arith.constant 0 : index
    %c0_2 = arith.constant 0 : index
    %2 = vector.load %arg2[%c0_1, %c0_2] : memref<32x128xbf16, #tpu.memory_space<vmem>>, vector<32x128xbf16>
    %cst = arith.constant dense<0.000000e+00> : vector<2x128xf32>
    %3 = tpu.matmul %1, %2, %cst {dimension_numbers = #tpu.dot_dimension_numbers<[1], [0], [0], [1], [0, 0, 1, 1], [], []>} : vector<2x32xbf16>, vector<32x128xbf16>, vector<2x128xf32> -> vector<2x128xf32>
    %c0_3 = arith.constant 0 : index
    %c0_4 = arith.constant 0 : index
    %c0_5 = arith.constant 0 : index
    %4 = vector.load %arg4[%c0_3, %c0_4, %c0_5] : memref<5x1x128xf32, #tpu.memory_space<vmem>>, vector<1x1x128xf32>
    %5 = vector.shape_cast %4 : vector<1x1x128xf32> to vector<1x128xf32>
    %6 = vector.broadcast %5 : vector<1x128xf32> to vector<2x128xf32>
    %7 = arith.addf %3, %6 : vector<2x128xf32>
    %8 = arith.truncf %7 : vector<2x128xf32> to vector<2x128xbf16>
    %c0_6 = arith.constant 0 : index
    %c0_7 = arith.constant 0 : index
    %c0_8 = arith.constant 0 : index
    %9 = vector.load %arg3[%c0_6, %c0_7, %c0_8] : memref<4x128x128xbf16, #tpu.memory_space<vmem>>, vector<1x128x128xbf16>
    %10 = vector.shape_cast %9 : vector<1x128x128xbf16> to vector<128x128xbf16>
    %cst_9 = arith.constant dense<0.000000e+00> : vector<2x128xf32>
    %11 = tpu.matmul %8, %10, %cst_9 {dimension_numbers = #tpu.dot_dimension_numbers<[1], [0], [0], [1], [0, 0, 1, 1], [], []>} : vector<2x128xbf16>, vector<128x128xbf16>, vector<2x128xf32> -> vector<2x128xf32>
    %c1 = arith.constant 1 : index
    %c0_10 = arith.constant 0 : index
    %c0_11 = arith.constant 0 : index
    %12 = vector.load %arg4[%c1, %c0_10, %c0_11] : memref<5x1x128xf32, #tpu.memory_space<vmem>>, vector<1x1x128xf32>
    %13 = vector.shape_cast %12 : vector<1x1x128xf32> to vector<1x128xf32>
    %14 = vector.broadcast %13 : vector<1x128xf32> to vector<2x128xf32>
    %15 = arith.addf %11, %14 : vector<2x128xf32>
    %16 = arith.truncf %15 : vector<2x128xf32> to vector<2x128xbf16>
    %c1_12 = arith.constant 1 : index
    %c0_13 = arith.constant 0 : index
    %c0_14 = arith.constant 0 : index
    %17 = vector.load %arg3[%c1_12, %c0_13, %c0_14] : memref<4x128x128xbf16, #tpu.memory_space<vmem>>, vector<1x128x128xbf16>
    %18 = vector.shape_cast %17 : vector<1x128x128xbf16> to vector<128x128xbf16>
    %cst_15 = arith.constant dense<0.000000e+00> : vector<2x128xf32>
    %19 = tpu.matmul %16, %18, %cst_15 {dimension_numbers = #tpu.dot_dimension_numbers<[1], [0], [0], [1], [0, 0, 1, 1], [], []>} : vector<2x128xbf16>, vector<128x128xbf16>, vector<2x128xf32> -> vector<2x128xf32>
    %c2 = arith.constant 2 : index
    %c0_16 = arith.constant 0 : index
    %c0_17 = arith.constant 0 : index
    %20 = vector.load %arg4[%c2, %c0_16, %c0_17] : memref<5x1x128xf32, #tpu.memory_space<vmem>>, vector<1x1x128xf32>
    %21 = vector.shape_cast %20 : vector<1x1x128xf32> to vector<1x128xf32>
    %22 = vector.broadcast %21 : vector<1x128xf32> to vector<2x128xf32>
    %23 = arith.addf %19, %22 : vector<2x128xf32>
    %24 = arith.truncf %23 : vector<2x128xf32> to vector<2x128xbf16>
    %c2_18 = arith.constant 2 : index
    %c0_19 = arith.constant 0 : index
    %c0_20 = arith.constant 0 : index
    %25 = vector.load %arg3[%c2_18, %c0_19, %c0_20] : memref<4x128x128xbf16, #tpu.memory_space<vmem>>, vector<1x128x128xbf16>
    %26 = vector.shape_cast %25 : vector<1x128x128xbf16> to vector<128x128xbf16>
    %cst_21 = arith.constant dense<0.000000e+00> : vector<2x128xf32>
    %27 = tpu.matmul %24, %26, %cst_21 {dimension_numbers = #tpu.dot_dimension_numbers<[1], [0], [0], [1], [0, 0, 1, 1], [], []>} : vector<2x128xbf16>, vector<128x128xbf16>, vector<2x128xf32> -> vector<2x128xf32>
    %c3 = arith.constant 3 : index
    %c0_22 = arith.constant 0 : index
    %c0_23 = arith.constant 0 : index
    %28 = vector.load %arg4[%c3, %c0_22, %c0_23] : memref<5x1x128xf32, #tpu.memory_space<vmem>>, vector<1x1x128xf32>
    %29 = vector.shape_cast %28 : vector<1x1x128xf32> to vector<1x128xf32>
    %30 = vector.broadcast %29 : vector<1x128xf32> to vector<2x128xf32>
    %31 = arith.addf %27, %30 : vector<2x128xf32>
    %32 = arith.truncf %31 : vector<2x128xf32> to vector<2x128xbf16>
    %c3_24 = arith.constant 3 : index
    %c0_25 = arith.constant 0 : index
    %c0_26 = arith.constant 0 : index
    %33 = vector.load %arg3[%c3_24, %c0_25, %c0_26] : memref<4x128x128xbf16, #tpu.memory_space<vmem>>, vector<1x128x128xbf16>
    %34 = vector.shape_cast %33 : vector<1x128x128xbf16> to vector<128x128xbf16>
    %cst_27 = arith.constant dense<0.000000e+00> : vector<2x128xf32>
    %35 = tpu.matmul %32, %34, %cst_27 {dimension_numbers = #tpu.dot_dimension_numbers<[1], [0], [0], [1], [0, 0, 1, 1], [], []>} : vector<2x128xbf16>, vector<128x128xbf16>, vector<2x128xf32> -> vector<2x128xf32>
    %c4 = arith.constant 4 : index
    %c0_28 = arith.constant 0 : index
    %c0_29 = arith.constant 0 : index
    %36 = vector.load %arg4[%c4, %c0_28, %c0_29] : memref<5x1x128xf32, #tpu.memory_space<vmem>>, vector<1x1x128xf32>
    %37 = vector.shape_cast %36 : vector<1x1x128xf32> to vector<1x128xf32>
    %38 = vector.broadcast %37 : vector<1x128xf32> to vector<2x128xf32>
    %39 = arith.addf %35, %38 : vector<2x128xf32>
    %c0_30 = arith.constant 0 : index
    %c0_31 = arith.constant 0 : index
    %40 = vector.load %arg5[%c0_30, %c0_31] : memref<2x128xf32, #tpu.memory_space<vmem>>, vector<2x128xf32>
    tpu.vector_store %arg5[%c0_30, %c0_31], %39 {strides = array<i32>} : memref<2x128xf32, #tpu.memory_space<vmem>>, vector<2x128xf32>,
    return
  }
  func.func @transform_0(%arg0: i32) -> (i32, i32) {
    %c0_i32 = arith.constant 0 : i32
    %c0_i32_0 = arith.constant 0 : i32
    return %arg0, %c0_i32 : i32, i32
  }
  func.func @transform_1(%arg0: i32) -> (i32, i32) {
    %c0_i32 = arith.constant 0 : i32
    %c0_i32_0 = arith.constant 0 : i32
    %c0_i32_1 = arith.constant 0 : i32
    return %c0_i32, %c0_i32_0 : i32, i32
  }
  func.func @transform_2(%arg0: i32) -> (i32, i32, i32) {
    %c0_i32 = arith.constant 0 : i32
    %c0_i32_0 = arith.constant 0 : i32
    %c0_i32_1 = arith.constant 0 : i32
    %c0_i32_2 = arith.constant 0 : i32
    return %c0_i32, %c0_i32_0, %c0_i32_1 : i32, i32, i32
  }
  func.func @transform_3(%arg0: i32) -> (i32, i32, i32) {
    %c0_i32 = arith.constant 0 : i32
    %c0_i32_0 = arith.constant 0 : i32
    %c0_i32_1 = arith.constant 0 : i32
    %c0_i32_2 = arith.constant 0 : i32
    return %c0_i32, %c0_i32_0, %c0_i32_1 : i32, i32, i32
  }
  func.func @transform_4(%arg0: i32) -> (i32, i32) {
    %c0_i32 = arith.constant 0 : i32
    %c0_i32_0 = arith.constant 0 : i32
    return %arg0, %c0_i32 : i32, i32
  }
}

</mosaic_0001>

<bundles_post_ra>
// kernel: tpu_custom_call.1
= control target key start
LH: loop header
LB: loop body
LE: loop exit
PB: predicated region body
PF: predicated region fallthrough
CT: control target
= control target key end

     0   :  { %9 = vsyncpa [#allocation3], 0  ;;  %s1052_s0 = inlined_call_operand.hbm [shape: f32[2,32], index: 0, kind: input, shape index: {}]   ;;  %s1053_s1 = inlined_call_operand.hbm [shape: bf16[32,128], index: 1, kind: input, shape index: {}]   ;;  %s1054_s2 = inlined_call_operand.hbm [shape: bf16[4,128,128], index: 2, kind: input, shape index: {}]   ;;  %s1055_s3 = inlined_call_operand.vmem [shape: f32[5,1,128], index: 3, kind: input, shape index: {}]   ;;  %s1056_s4 = inlined_call_operand.hbm [shape: f32[2,128], index: 4, kind: output, shape index: {}]  }
   0x1   :  { %10 = vsyncpa [#allocation6], 0 }
   0x2   :  { %11 = vsyncpa [#allocation4], 0  ;;  %s906_s15 = smov [#allocation5]   ;;  %s812_s19 = scalar_lea.hbm %s1053_s1, 256 }
   0x3   :  { %s27_s16 = sshll.u32 %s906_s15, 4  ;;  %p813_p0 = scmp.ne.s32.totalorder %s1053_s1, %s812_s19  ;;  %s28_s16 = int_to_ptr.vmem [resolvable:$true] %s27_s16 }
   0x4   :  { %p816_p1 = scmp.lt.u32.totalorder %s812_s19, %s1053_s1 }
   0x6   :  { %p818_p2 = pnand %p816_p1, %p813_p0 }
   0x8   :  { %821 = shalt.err (!%p818_p2)
}
   0x9   :  { %s822_s24 = scalar_lea.vmem %s28_s16, 256  ;;  %p827_p4 = scmp.lt.s32.totalorder %s28_s16, %s28_s16 }
   0xa   :  { %p823_p3 = scmp.ne.s32.totalorder %s28_s16, %s822_s24  ;;  %p828_p5 = scmp.lt.s32.totalorder %s822_s24, %s822_s24 }
   0xc   :  { %p829_p6 = por %p828_p5, %p827_p4 }
   0xe   :  { %p830_p7 = pnand %p829_p6, %p823_p3 }
  0x10   :  { %833 = shalt.err (!%p830_p7)
}
  0x11   :  { %s907_s25 = smov 64   ;;  %s908_s26 = smov 4  }
  0x12   :  { %33 = dma.hbm_to_vmem [thread:$0]  %s1053_s1, 256, %s28_s16, [#allocation6], %s907_s25, %s907_s25, %s908_s26  }
  0x13   :  { %s909_s29 = smov [#allocation2]   ;;  %s910_s5 = smov [#allocation7]  }
  0x14   :  { %s18_s30 = sshll.u32 %s909_s29, 4  ;;  %s39_s6 = sshll.u32 %s910_s5, 4  ;;  %s19_s30 = int_to_ptr.vmem [resolvable:$true] %s18_s30  ;;  %s40_s6 = int_to_ptr.vmem [resolvable:$true] %s39_s6 }
  0x15   :  { %s834_s9 = scalar_lea.hbm %s1052_s0, 32 }
  0x16   :  { %p835_p8 = scmp.ne.s32.totalorder %s1052_s0, %s834_s9  ;;  %p838_p9 = scmp.lt.u32.totalorder %s834_s9, %s1052_s0 }
  0x18   :  { %p840_p10 = pnand %p838_p9, %p835_p8 }
  0x1a   :  { %843 = shalt.err (!%p840_p10)
}
  0x1b   :  { %s844_s1 = scalar_lea.vmem %s19_s30, 32  ;;  %p849_p12 = scmp.lt.s32.totalorder %s19_s30, %s19_s30 }
  0x1c   :  { %p845_p11 = scmp.ne.s32.totalorder %s19_s30, %s844_s1  ;;  %p850_p13 = scmp.lt.s32.totalorder %s844_s1, %s844_s1 }
  0x1e   :  { %p851_p0 = por %p850_p13, %p849_p12 }
  0x20   :  { %p852_p1 = pnand %p851_p0, %p845_p11 }
  0x22   :  { %855 = shalt.err (!%p852_p1)
}
  0x23   :  { %21 = dma.hbm_to_vmem [thread:$0]  %s1052_s0, 32, %s19_s30, [#allocation3]  }
  0x24   :  { %s856_s18 = scalar_lea.hbm %s1054_s2, 4096 }
  0x25   :  { %p857_p2 = scmp.ne.s32.totalorder %s1054_s2, %s856_s18  ;;  %p860_p3 = scmp.lt.u32.totalorder %s856_s18, %s1054_s2 }
  0x27   :  { %p862_p4 = pnand %p860_p3, %p857_p2 }
  0x29   :  { %865 = shalt.err (!%p862_p4)
}
  0x2a   :  { %s866_s23 = scalar_lea.vmem %s40_s6, 4096  ;;  %p871_p6 = scmp.lt.s32.totalorder %s40_s6, %s40_s6 }
  0x2b   :  { %p867_p5 = scmp.ne.s32.totalorder %s40_s6, %s866_s23  ;;  %p872_p7 = scmp.lt.s32.totalorder %s866_s23, %s866_s23 }
  0x2d   :  { %p873_p8 = por %p872_p7, %p871_p6 }
  0x2f   :  { %p874_p9 = pnand %p873_p8, %p867_p5 }
  0x31   :  { %877 = shalt.err (!%p874_p9)
}
  0x32   :  { %45 = dma.hbm_to_vmem [thread:$0]  %s1054_s2, 4096, %s40_s6, [#allocation6], %s907_s25, %s907_s25, %s908_s26  }
  0x33   :  { %900 = dma.done.wait [#allocation3], 32  }
  0x34   :  { %901 = vsyncadd [#allocation3], 4294967264 }
  0x35   :  { %902 = dma.done.wait [#allocation6], 4352  }
  0x36   :  { %903 = vsyncadd [#allocation6], 4294962944  ;;  %v911_v0 = vmov 0.0   ;;  %vm912_vm0 = vmmov 0   ;;  %v778_v1 = vld [vmem:[#allocation5] sm:$0xff]   ;;  %v779_v2 = vld [vmem:[#allocation5 + $0x8] sm:$0xff]  }
  0x37   :  { %682 = vmatprep.subr.bf16.mxu0 %v911_v0  ;;  %686 = vmatprep.mubr.msk.bf16.mxu0 %vm912_vm0, %v911_v0  ;;  %v58_v3 = vld [vmem:[#allocation2] sm:$0x3]  ;;  %v780_v4 = vld [vmem:[#allocation7] sm:$0xff]   ;;  %vm83_vm1 = vcmask 261120   ;;  %v782_v7 = vld [vmem:[#allocation7 + $0x10] sm:$0xff]   ;;  %s913_s8 = smov [#allocation8]  }
  0x38   :  { %690 = vmatprep.subr.bf16.mxu1 %v911_v0  ;;  %706 = vmatprep.mubr.msk.bf16.mxu1 %vm912_vm0, %v911_v0  ;;  %v59_v5 = vpack.c.bf16 %v58_v3, %v58_v3  ;;  %v781_v6 = vld [vmem:[#allocation7 + $0x8] sm:$0xff]   ;;  %v783_v8 = vld [vmem:[#allocation7 + $0x18] sm:$0xff]   ;;  %v784_v9 = vld [vmem:[#allocation7 + $0x20] sm:$0xff]   ;;  %s589_s9 = sshll.u32 %s913_s8, 4  ;;  %s590_s9 = int_to_ptr.vmem [resolvable:$true] %s589_s9 }
  0x39   :  { %683 = vmatpush3.bf16.msra.mxu0 %v778_v1  ;;  %691 = vmatpush3.bf16.msra.mxu1 %v780_v4  ;;  %v785_v10 = vld [vmem:[#allocation7 + $0x28] sm:$0xff]   ;;  %v786_v11 = vld [vmem:[#allocation7 + $0x30] sm:$0xff]   ;;  %v787_v12 = vld [vmem:[#allocation7 + $0x38] sm:$0xff]   ;;  %s878_s10 = scalar_lea.vmem %s590_s9, 32  ;;  %p883_p11 = scmp.lt.s32.totalorder %s590_s9, %s590_s9 }
  0x3a   :  { %684 = vmatprep.subr.bf16.mxu0 %v911_v0  ;;  %692 = vmatprep.subr.bf16.mxu1 %v911_v0  ;;  %v788_v13 = vld [vmem:[#allocation7 + $0x40] sm:$0xff]   ;;  %v789_v14 = vld [vmem:[#allocation7 + $0x48] sm:$0xff]   ;;  %v790_v15 = vld [vmem:[#allocation7 + $0x50] sm:$0xff]   ;;  %p879_p10 = scmp.ne.s32.totalorder %s590_s9, %s878_s10  ;;  %p884_p12 = scmp.lt.s32.totalorder %s878_s10, %s878_s10 }
  0x3b   :  { %v791_v16 = vld [vmem:[#allocation7 + $0x58] sm:$0xff]   ;;  %v792_v17 = vld [vmem:[#allocation7 + $0x60] sm:$0xff]   ;;  %v793_v18 = vld [vmem:[#allocation7 + $0x68] sm:$0xff]  }
  0x3c   :  { %v794_v19 = vld [vmem:[#allocation7 + $0x70] sm:$0xff]   ;;  %v599_v20 = vld [vmem:[%s1055_s3] ss:$0 sm:$0xff]  ;;  %v795_v27 = vld [vmem:[#allocation7 + $0x78] sm:$0xff]   ;;  %p885_p13 = por %p884_p12, %p883_p11 }
  0x3d   :  { %685 = vmatpush3.bf16.msra.mxu0 %v779_v2  ;;  %693 = vmatpush3.bf16.msra.mxu1 %v781_v6  ;;  %v796_v28 = vld [vmem:[#allocation7 + $0x80] sm:$0xff]   ;;  %v797_v29 = vld [vmem:[#allocation7 + $0x88] sm:$0xff]   ;;  %v798_v30 = vld [vmem:[#allocation7 + $0x90] sm:$0xff]  }
  0x3e   :  { %710 = vmatprep.subr.bf16.mxu0 %v911_v0  ;;  %694 = vmatprep.subr.bf16.mxu1 %v911_v0  ;;  %v799_v31 = vld [vmem:[#allocation7 + $0x98] sm:$0xff]   ;;  %v800_v32 = vld [vmem:[#allocation7 + $0xa0] sm:$0xff]   ;;  %v801_v33 = vld [vmem:[#allocation7 + $0xa8] sm:$0xff]   ;;  %p886_p0 = pnand %p885_p13, %p879_p10 }
  0x3f   :  { %v802_v34 = vld [vmem:[#allocation7 + $0xb0] sm:$0xff]   ;;  %v604_v35 = vld [vmem:[%s1055_s3 + $0x1] ss:$0 sm:$0xff]  ;;  %v803_v42 = vld [vmem:[#allocation7 + $0xb8] sm:$0xff]  }
  0x40   :  { %687 = vmatmul.mubr.msk.bf16.vlgmr.msra.gmra.mrb[0].mxu0 %vm83_vm1, %v59_v5  ;;  %v804_v43 = vld [vmem:[#allocation7 + $0xc0] sm:$0xff]   ;;  %v805_v44 = vld [vmem:[#allocation7 + $0xc8] sm:$0xff]   ;;  %v806_v45 = vld [vmem:[#allocation7 + $0xd0] sm:$0xff]  }
  0x41   :  { %726 = vmatprep.mubr.msk.bf16.mxu0 %vm912_vm0, %v911_v0  ;;  %695 = vmatpush3.bf16.msra.mxu1 %v782_v7  ;;  %v807_v46 = vld [vmem:[#allocation7 + $0xd8] sm:$0xff]   ;;  %v808_v47 = vld [vmem:[#allocation7 + $0xe0] sm:$0xff]   ;;  %v809_v48 = vld [vmem:[#allocation7 + $0xe8] sm:$0xff]  }
  0x42   :  { %696 = vmatprep.subr.bf16.mxu1 %v911_v0  ;;  %711 = vmatpush3.bf16.msra.mxu0 %v788_v13  ;;  %v810_v49 = vld [vmem:[#allocation7 + $0xf0] sm:$0xff]   ;;  %v614_v50 = vld [vmem:[%s1055_s3 + $0x2] ss:$0 sm:$0xff]  ;;  %v811_v57 = vld [vmem:[#allocation7 + $0xf8] sm:$0xff]  }
  0x43   :  { %712 = vmatprep.subr.bf16.mxu0 %v911_v0  ;;  %v624_v58 = vld [vmem:[%s1055_s3 + $0x3] ss:$0 sm:$0xff]  ;;  %v634_v1 = vld [vmem:[%s1055_s3 + $0x4] ss:$0 sm:$0xff] }
  0x45   :  { %697 = vmatpush3.bf16.msra.mxu1 %v783_v8 }
  0x46   :  { %698 = vmatprep.subr.bf16.mxu1 %v911_v0  ;;  %713 = vmatpush3.bf16.msra.mxu0 %v789_v14 }
  0x47   :  { %714 = vmatprep.subr.bf16.mxu0 %v911_v0 }
  0x49   :  { %699 = vmatpush3.bf16.msra.mxu1 %v784_v9 }
  0x4a   :  { %700 = vmatprep.subr.bf16.mxu1 %v911_v0  ;;  %715 = vmatpush3.bf16.msra.mxu0 %v790_v15 }
  0x4b   :  { %716 = vmatprep.subr.bf16.mxu0 %v911_v0 }
  0x4d   :  { %701 = vmatpush3.bf16.msra.mxu1 %v785_v10 }
  0x4e   :  { %702 = vmatprep.subr.bf16.mxu1 %v911_v0  ;;  %717 = vmatpush3.bf16.msra.mxu0 %v791_v16 }
  0x4f   :  { %718 = vmatprep.subr.bf16.mxu0 %v911_v0 }
  0x51   :  { %703 = vmatpush3.bf16.msra.mxu1 %v786_v11 }
  0x52   :  { %704 = vmatprep.subr.bf16.mxu1 %v911_v0  ;;  %719 = vmatpush3.bf16.msra.mxu0 %v792_v17 }
  0x53   :  { %720 = vmatprep.subr.bf16.mxu0 %v911_v0 }
  0x55   :  { %705 = vmatpush3.bf16.msra.mxu1 %v787_v12 }
  0x56   :  { %730 = vmatprep.subr.bf16.mxu1 %v911_v0  ;;  %721 = vmatpush3.bf16.msra.mxu0 %v793_v18 }
  0x57   :  { %722 = vmatprep.subr.bf16.mxu0 %v911_v0 }
  0x5a   :  { %723 = vmatpush3.bf16.msra.mxu0 %v794_v19 }
  0x5b   :  { %724 = vmatprep.subr.bf16.mxu0 %v911_v0 }
  0x5e   :  { %725 = vmatpush3.bf16.msra.mxu0 %v795_v27 }
  0x5f   :  { %750 = vmatprep.subr.bf16.mxu0 %v911_v0 }
 0x113   :  { %v121_v21 = vpop.f32.mrb[0].mxu0 }
 0x114   :  { %v122_v22 = vadd.f32 %v599_v20, %v121_v21  ;;  %v688_v23 = vpop.f32.mrb[1].mxu0 }
 0x115   :  { %v124_v24 = vpop.f32.mrb[2].mxu0 }
 0x116   :  { %v127_v25 = vpack.c.bf16 %v122_v22, %v122_v22  ;;  %v689_v26 = vpop.f32.mrb[3].mxu0 }
 0x118   :  { %707 = vmatmul.mubr.bf16.vlgmr.msra.gmra.mrb[0].mxu1 %v127_v25 }
 0x119   :  { %746 = vmatprep.mubr.msk.bf16.mxu1 %vm912_vm0, %v911_v0  ;;  %731 = vmatpush3.bf16.msra.mxu1 %v796_v28 }
 0x11a   :  { %732 = vmatprep.subr.bf16.mxu1 %v911_v0 }
 0x11d   :  { %733 = vmatpush3.bf16.msra.mxu1 %v797_v29 }
 0x11e   :  { %734 = vmatprep.subr.bf16.mxu1 %v911_v0 }
 0x121   :  { %735 = vmatpush3.bf16.msra.mxu1 %v798_v30 }
 0x122   :  { %736 = vmatprep.subr.bf16.mxu1 %v911_v0 }
 0x125   :  { %737 = vmatpush3.bf16.msra.mxu1 %v799_v31 }
 0x126   :  { %738 = vmatprep.subr.bf16.mxu1 %v911_v0 }
 0x129   :  { %739 = vmatpush3.bf16.msra.mxu1 %v800_v32 }
 0x12a   :  { %740 = vmatprep.subr.bf16.mxu1 %v911_v0 }
 0x12d   :  { %741 = vmatpush3.bf16.msra.mxu1 %v801_v33 }
 0x12e   :  { %742 = vmatprep.subr.bf16.mxu1 %v911_v0 }
 0x131   :  { %743 = vmatpush3.bf16.msra.mxu1 %v802_v34 }
 0x132   :  { %744 = vmatprep.subr.bf16.mxu1 %v911_v0 }
 0x135   :  { %745 = vmatpush3.bf16.msra.mxu1 %v803_v42 }
 0x1eb   :  { %v234_v36 = vpop.f32.mrb[0].mxu1 }
 0x1ec   :  { %v235_v37 = vadd.f32 %v604_v35, %v234_v36  ;;  %v708_v38 = vpop.f32.mrb[1].mxu1 }
 0x1ed   :  { %v237_v39 = vpop.f32.mrb[2].mxu1 }
 0x1ee   :  { %v240_v40 = vpack.c.bf16 %v235_v37, %v235_v37  ;;  %v709_v41 = vpop.f32.mrb[3].mxu1 }
 0x1f0   :  { %727 = vmatmul.mubr.bf16.vlgmr.msra.gmra.mrb[4].mxu0 %v240_v40 }
 0x1f1   :  { %766 = vmatprep.mubr.msk.bf16.mxu0 %vm912_vm0, %v911_v0  ;;  %751 = vmatpush3.bf16.msra.mxu0 %v804_v43 }
 0x1f2   :  { %752 = vmatprep.subr.bf16.mxu0 %v911_v0 }
 0x1f5   :  { %753 = vmatpush3.bf16.msra.mxu0 %v805_v44 }
 0x1f6   :  { %754 = vmatprep.subr.bf16.mxu0 %v911_v0 }
 0x1f9   :  { %755 = vmatpush3.bf16.msra.mxu0 %v806_v45 }
 0x1fa   :  { %756 = vmatprep.subr.bf16.mxu0 %v911_v0 }
 0x1fd   :  { %757 = vmatpush3.bf16.msra.mxu0 %v807_v46 }
 0x1fe   :  { %758 = vmatprep.subr.bf16.mxu0 %v911_v0 }
 0x201   :  { %759 = vmatpush3.bf16.msra.mxu0 %v808_v47 }
 0x202   :  { %760 = vmatprep.subr.bf16.mxu0 %v911_v0 }
 0x205   :  { %761 = vmatpush3.bf16.msra.mxu0 %v809_v48 }
 0x206   :  { %762 = vmatprep.subr.bf16.mxu0 %v911_v0 }
 0x209   :  { %763 = vmatpush3.bf16.msra.mxu0 %v810_v49 }
 0x20a   :  { %764 = vmatprep.subr.bf16.mxu0 %v911_v0 }
 0x20d   :  { %765 = vmatpush3.bf16.msra.mxu0 %v811_v57 }
 0x2c3   :  { %v348_v51 = vpop.f32.mrb[4].mxu0 }
 0x2c4   :  { %v349_v52 = vadd.f32 %v614_v50, %v348_v51  ;;  %v728_v53 = vpop.f32.mrb[5].mxu0 }
 0x2c5   :  { %v351_v54 = vpop.f32.mrb[6].mxu0 }
 0x2c6   :  { %v354_v55 = vpack.c.bf16 %v349_v52, %v349_v52  ;;  %v729_v56 = vpop.f32.mrb[7].mxu0 }
 0x2c8   :  { %747 = vmatmul.mubr.bf16.vlgmr.msra.gmra.mrb[4].mxu1 %v354_v55 }
 0x39b   :  { %v462_v59 = vpop.f32.mrb[4].mxu1 }
 0x39c   :  { %v463_v60 = vadd.f32 %v624_v58, %v462_v59  ;;  %v748_v61 = vpop.f32.mrb[5].mxu1 }
 0x39d   :  { %v465_v62 = vpop.f32.mrb[6].mxu1 }
 0x39e   :  { %v468_v63 = vpack.c.bf16 %v463_v60, %v463_v60  ;;  %v749_v0 = vpop.f32.mrb[7].mxu1 }
 0x3a0   :  { %767 = vmatmul.mubr.bf16.vlgmr.msra.gmra.mrb[8].mxu0 %v468_v63 }
 0x473   :  { %v576_v2 = vpop.f32.mrb[8].mxu0 }
 0x474   :  { %v577_v3 = vadd.f32 %v634_v1, %v576_v2  ;;  %v768_v4 = vpop.f32.mrb[9].mxu0 }
 0x475   :  { %v579_v5 = vpop.f32.mrb[10].mxu0 }
 0x476   :  { %582 = vst [vmem:[#allocation8] sm:$0x3] %v577_v3  ;;  %v769_v6 = vpop.f32.mrb[11].mxu0 }
 0x477   :  { %889 = shalt.err (!%p886_p0)
}
 0x478   :  { %s890_s3 = scalar_lea.hbm %s1056_s4, 32 }
 0x479   :  { %p891_p1 = scmp.ne.s32.totalorder %s1056_s4, %s890_s3  ;;  %p894_p2 = scmp.lt.u32.totalorder %s890_s3, %s1056_s4 }
 0x47b   :  { %p896_p3 = pnand %p894_p2, %p891_p1 }
 0x47d   :  { %899 = shalt.err (!%p896_p3)
}
 0x47e   :  { %592 = dma.vmem_to_hbm [thread:$0]  %s590_s9, 32, %s1056_s4, [#allocation4]  }
 0x47f   :  { %904 = dma.done.wait [#allocation4], 32  }
 0x480   :  { %905 = vsyncadd [#allocation4], 4294967264 }
 0x481   :  { %596 = vsyncpa [#allocation3], 1 }
 0x482   :  { %597 = vsyncpa [#allocation6], 1 }
 0x483   :  { %598 = vsyncpa [#allocation4], 1 }

</bundles_post_ra>
